<compile_context>
chip_gen: v7x
topology: tpu7x:2x2x1
jax: 0.10.0
libtpu: 0.0.40
codegen_flags: <defaults>
</compile_context>

<pallas_src>
import functools

import jax
import jax.numpy as jnp
from jax.experimental import pallas as pl
from jax.experimental.pallas import tpu as pltpu

LN_EPS = 1e-5


def _round_up(x, m):
    return ((x + m - 1) // m) * m


def addnorm_kernel(x_ref, y_ref, gamma_ref, beta_ref, o_ref, *, h_real, h_pad):
    # Residual add; dropout is identity in the deterministic (eval) forward.
    # TODO(synk): training-mode dropout would use pltpu.prng_seed /
    # pltpu.stateful_bernoulli; only the eval-mode forward is implemented here.
    z = x_ref[...].astype(jnp.float32) + y_ref[...].astype(jnp.float32)

    # Centered two-pass LayerNorm statistics over the last (lane) axis in f32.
    # Padded lanes of x/y are zero, so sum(z)/h_real is the true mean.
    inv_h = jnp.float32(1.0 / h_real)
    mean = jnp.sum(z, axis=-1, keepdims=True) * inv_h
    zc = z - mean
    if h_pad != h_real:
        # Zero the centered term on padded lanes so the variance only sees
        # the real h_real columns (compile-time branch; absent when H%128==0).
        lane = jax.lax.broadcasted_iota(jnp.int32, z.shape, dimension=1)
        zc = jnp.where(lane < h_real, zc, 0.0)
    var = jnp.sum(zc * zc, axis=-1, keepdims=True) * inv_h
    inv = jax.lax.rsqrt(var + LN_EPS)  # EUP slot — effectively free here

    gamma = gamma_ref[...]  # (1, H_pad) broadcast over rows
    beta = beta_ref[...]
    o_ref[...] = (zc * inv * gamma + beta).astype(o_ref.dtype)


def add_norm(x, y, gamma, beta, *, vmem_io_budget_bytes=None):
    """LayerNorm(y + x) over the last axis.  x, y: (B, S, H); gamma, beta: (H,)."""
    assert x.shape == y.shape
    B, S, H = x.shape
    R = B * S

    # --- generation-aware VMEM budgeting ---------------------------------
    try:
        vmem_cap = int(pltpu.get_tpu_info().vmem_capacity_bytes)
    except Exception:
        vmem_cap = 64 * 1024 * 1024  # conservative fallback (v7x-sized)
    # Scoped limit: 3/4 of physical, never above 96 MiB.
    #   v5e/v6e (128 MiB) -> 96 MiB;  v7x (64 MiB) -> 48 MiB.
    vmem_limit_bytes = min((vmem_cap * 3) // 4, 96 * 1024 * 1024)
    if vmem_io_budget_bytes is None:
        vmem_io_budget_bytes = vmem_limit_bytes // 2

    # --- lane-dense hidden dim -------------------------------------------
    H_pad = _round_up(H, 128)
    x2 = x.reshape(R, H)
    y2 = y.reshape(R, H)
    g2 = gamma.reshape(1, H).astype(jnp.float32)
    b2 = beta.reshape(1, H).astype(jnp.float32)
    if H_pad != H:
        pad = ((0, 0), (0, H_pad - H))
        x2 = jnp.pad(x2, pad)
        y2 = jnp.pad(y2, pad)
        g2 = jnp.pad(g2, pad)
        b2 = jnp.pad(b2, pad)

    itemsize = jnp.dtype(x.dtype).itemsize
    # Sublane packing: 8 rows for 32-bit dtypes, 16 for bf16, 32 for 8-bit.
    sublane = max(8, 32 // itemsize)

    # Per-row VMEM cost: x / y / out double-buffered (3 arrays x 2 buffers)
    # plus ~4 rows worth of f32 working set (z, zc, zc*zc, misc temps).
    bytes_per_row = 3 * 2 * H_pad * itemsize + 4 * H_pad * 4
    block_rows = max(sublane, vmem_io_budget_bytes // bytes_per_row)

    # Bytes-per-tile clamp instead of a hard row clamp: cap each input tile
    # at ~8 MiB of HBM traffic (multi-MiB tiles -> per-step overhead <10%).
    max_tile_bytes = 8 * 1024 * 1024
    cap_rows = max(sublane, max_tile_bytes // (H_pad * itemsize))
    block_rows = min(block_rows, cap_rows)
    block_rows = max(sublane, (block_rows // sublane) * sublane)

    # Don't make the block larger than the (sublane-padded) row count.
    rows_padded = _round_up(R, sublane)
    block_rows = min(block_rows, rows_padded)

    # Guarantee >= 2 grid steps when possible so the "parallel" axis can be
    # sharded across both TensorCores on v7x (neutral on 1-TC chips).
    if pl.cdiv(R, block_rows) == 1 and rows_padded > sublane:
        block_rows = _round_up(-(-R // 2), sublane)

    grid = (pl.cdiv(R, block_rows),)  # ragged last block is masked by Pallas

    kernel = functools.partial(addnorm_kernel, h_real=H, h_pad=H_pad)

    out = pl.pallas_call(
        kernel,
        out_shape=jax.ShapeDtypeStruct((R, H_pad), x.dtype),
        grid_spec=pltpu.PrefetchScalarGridSpec(
            num_scalar_prefetch=0,
            grid=grid,
            in_specs=[
                pl.BlockSpec((block_rows, H_pad), lambda i: (i, 0)),  # X rows
                pl.BlockSpec((block_rows, H_pad), lambda i: (i, 0)),  # Y rows
                pl.BlockSpec((1, H_pad), lambda i: (0, 0)),           # gamma (resident)
                pl.BlockSpec((1, H_pad), lambda i: (0, 0)),           # beta  (resident)
            ],
            out_specs=pl.BlockSpec((block_rows, H_pad), lambda i: (i, 0)),
        ),
        compiler_params=pltpu.CompilerParams(
            # Row axis is "parallel": v7x shards it across both TCs;
            # measured neutral on v5e/v6e.
            dimension_semantics=("parallel",),
            # Raise v5e's 16 MiB scoped default; stay within v7x's 64 MiB.
            vmem_limit_bytes=vmem_limit_bytes,
        ),
    )(x2, y2, g2, b2)

    if H_pad != H:
        out = out[:, :H]
    return out.reshape(B, S, H)


if __name__ == "__main__":
    batch, seq, hidden = 2, 8, 128  # lane-dense hidden dim (multiple of 128)
    key = jax.random.PRNGKey(0)
    ky, kg, kb = jax.random.split(key, 3)

    # X = ones (as in the reference snippet), Y = random "sublayer output".
    X = jnp.ones((batch, seq, hidden), dtype=jnp.float32)
    Y = jax.random.normal(ky, (batch, seq, hidden), dtype=jnp.float32)

    # Non-trivial gamma/beta to exercise the affine broadcast path
    # (PyTorch init would be gamma=1, beta=0).
    gamma = 1.0 + 0.1 * jax.random.normal(kg, (hidden,), dtype=jnp.float32)
    beta = 0.1 * jax.random.normal(kb, (hidden,), dtype=jnp.float32)

    out = add_norm(X, Y, gamma, beta)
    out = jax.block_until_ready(out)

    # Pure-JAX reference check
    z = X + Y
    mean = jnp.mean(z, axis=-1, keepdims=True)
    var = jnp.mean((z - mean) ** 2, axis=-1, keepdims=True)
    ref = (z - mean) / jnp.sqrt(var + LN_EPS) * gamma + beta
    assert jnp.allclose(out, ref, atol=1e-5, rtol=1e-5), "mismatch vs reference"

    print("KERNEL_OK")
</pallas_src>

<mosaic_0001>
module attributes {stable_mosaic.version = 11 : i64} {
  func.func @addnorm_kernel(%arg0: i32, %arg1: memref<8x128xf32, #tpu.memory_space<vmem>>, %arg2: memref<8x128xf32, #tpu.memory_space<vmem>>, %arg3: memref<1x128xf32, #tpu.memory_space<vmem>>, %arg4: memref<1x128xf32, #tpu.memory_space<vmem>>, %arg5: memref<8x128xf32, #tpu.memory_space<vmem>>) attributes {dimension_semantics = [#tpu.dimension_semantics<parallel>], iteration_bounds = array<i64: 2>, scalar_prefetch = 0 : i64, scratch_operands = 0 : i64, tpu.core_type = #tpu.core_type<tc>, window_params = [{transform_indices = @transform_0, window_bounds = array<i64: 8, 128>}, {transform_indices = @transform_1, window_bounds = array<i64: 8, 128>}, {pipeline_mode = #tpu.pipeline_mode<synchronous>, transform_indices = @transform_2, window_bounds = array<i64: 1, 128>}, {pipeline_mode = #tpu.pipeline_mode<synchronous>, transform_indices = @transform_3, window_bounds = array<i64: 1, 128>}, {transform_indices = @transform_4, window_bounds = array<i64: 8, 128>}]} {
    %c0 = arith.constant 0 : index
    %c0_0 = arith.constant 0 : index
    %0 = vector.load %arg1[%c0, %c0_0] : memref<8x128xf32, #tpu.memory_space<vmem>>, vector<8x128xf32>
    %c0_1 = arith.constant 0 : index
    %c0_2 = arith.constant 0 : index
    %1 = vector.load %arg2[%c0_1, %c0_2] : memref<8x128xf32, #tpu.memory_space<vmem>>, vector<8x128xf32>
    %2 = arith.addf %0, %1 : vector<8x128xf32>
    %cst = arith.constant dense<0.000000e+00> : vector<8xf32>
    %3 = vector.multi_reduction <add>, %2, %cst [1] : vector<8x128xf32> to vector<8xf32>
    %4 = vector.shape_cast %3 : vector<8xf32> to vector<8x1xf32>
    %cst_3 = arith.constant 7.812500e-03 : f32
    %5 = vector.broadcast %cst_3 : f32 to vector<8x1xf32>
    %6 = arith.mulf %4, %5 : vector<8x1xf32>
    %7 = vector.broadcast %6 : vector<8x1xf32> to vector<8x128xf32>
    %8 = arith.subf %2, %7 : vector<8x128xf32>
    %9 = arith.mulf %8, %8 : vector<8x128xf32>
    %cst_4 = arith.constant dense<0.000000e+00> : vector<8xf32>
    %10 = vector.multi_reduction <add>, %9, %cst_4 [1] : vector<8x128xf32> to vector<8xf32>
    %11 = vector.shape_cast %10 : vector<8xf32> to vector<8x1xf32>
    %cst_5 = arith.constant 7.812500e-03 : f32
    %12 = vector.broadcast %cst_5 : f32 to vector<8x1xf32>
    %13 = arith.mulf %11, %12 : vector<8x1xf32>
    %cst_6 = arith.constant 9.99999974E-6 : f32
    %14 = vector.broadcast %cst_6 : f32 to vector<8x1xf32>
    %15 = arith.addf %13, %14 : vector<8x1xf32>
    %16 = math.rsqrt %15 : vector<8x1xf32>
    %c0_7 = arith.constant 0 : index
    %c0_8 = arith.constant 0 : index
    %17 = vector.load %arg3[%c0_7, %c0_8] : memref<1x128xf32, #tpu.memory_space<vmem>>, vector<1x128xf32>
    %c0_9 = arith.constant 0 : index
    %c0_10 = arith.constant 0 : index
    %18 = vector.load %arg4[%c0_9, %c0_10] : memref<1x128xf32, #tpu.memory_space<vmem>>, vector<1x128xf32>
    %19 = vector.broadcast %16 : vector<8x1xf32> to vector<8x128xf32>
    %20 = arith.mulf %8, %19 : vector<8x128xf32>
    %21 = vector.broadcast %17 : vector<1x128xf32> to vector<8x128xf32>
    %22 = arith.mulf %20, %21 : vector<8x128xf32>
    %23 = vector.broadcast %18 : vector<1x128xf32> to vector<8x128xf32>
    %24 = arith.addf %22, %23 : vector<8x128xf32>
    %c0_11 = arith.constant 0 : index
    %c0_12 = arith.constant 0 : index
    %25 = vector.load %arg5[%c0_11, %c0_12] : memref<8x128xf32, #tpu.memory_space<vmem>>, vector<8x128xf32>
    tpu.vector_store %arg5[%c0_11, %c0_12], %24 {strides = array<i32>} : memref<8x128xf32, #tpu.memory_space<vmem>>, vector<8x128xf32>,
    return
  }
  func.func @transform_0(%arg0: i32) -> (i32, i32) {
    %c0_i32 = arith.constant 0 : i32
    %c0_i32_0 = arith.constant 0 : i32
    return %arg0, %c0_i32 : i32, i32
  }
  func.func @transform_1(%arg0: i32) -> (i32, i32) {
    %c0_i32 = arith.constant 0 : i32
    %c0_i32_0 = arith.constant 0 : i32
    return %arg0, %c0_i32 : i32, i32
  }
  func.func @transform_2(%arg0: i32) -> (i32, i32) {
    %c0_i32 = arith.constant 0 : i32
    %c0_i32_0 = arith.constant 0 : i32
    %c0_i32_1 = arith.constant 0 : i32
    return %c0_i32, %c0_i32_0 : i32, i32
  }
  func.func @transform_3(%arg0: i32) -> (i32, i32) {
    %c0_i32 = arith.constant 0 : i32
    %c0_i32_0 = arith.constant 0 : i32
    %c0_i32_1 = arith.constant 0 : i32
    return %c0_i32, %c0_i32_0 : i32, i32
  }
  func.func @transform_4(%arg0: i32) -> (i32, i32) {
    %c0_i32 = arith.constant 0 : i32
    %c0_i32_0 = arith.constant 0 : i32
    return %arg0, %c0_i32 : i32, i32
  }
}

</mosaic_0001>

<bundles_post_ra>
// kernel: tpu_custom_call.1
= control target key start
LH: loop header
LB: loop body
LE: loop exit
PB: predicated region body
PF: predicated region fallthrough
CT: control target
= control target key end

     0   :  { %9 = vsyncpa [#allocation3], 0  ;;  %s838_s0 = inlined_call_operand.hbm [shape: f32[16,128], index: 0, kind: input, shape index: {}]   ;;  %s839_s1 = inlined_call_operand.hbm [shape: f32[16,128], index: 1, kind: input, shape index: {}]   ;;  %s840_s2 = inlined_call_operand.vmem [shape: f32[1,128], index: 2, kind: input, shape index: {}]   ;;  %s841_s3 = inlined_call_operand.vmem [shape: f32[1,128], index: 3, kind: input, shape index: {}]   ;;  %s842_s4 = inlined_call_operand.hbm [shape: f32[16,128], index: 4, kind: output, shape index: {}]  }
   0x1   :  { %11 = vsyncpa [#allocation3 + $0x1], 0 }
   0x2   :  { %12 = vsyncpa [#allocation6], 0 }
   0x3   :  { %14 = vsyncpa [#allocation6 + $0x1], 0 }
   0x4   :  { %15 = vsyncpa [#allocation4], 0 }
   0x5   :  { %17 = vsyncpa [#allocation4 + $0x1], 0  ;;  %s618_s15 = smov 0   ;;  %s620_s16 = smov 0  }
   0x6   :  { %s622_s17 = smov 0   ;;  %s624_s18 = smov 0  }
   0x7 LB: > { %s639_s19 = sadd.s32 4294967295, %s588_s18   ;;  %s388_s20 = sadd.s32 4294967294, %s588_s18   ;;  %s588_s18 = sphi %s624_s18, %s861_s18   ;;  %s584_s17 = sphi %s622_s17, %s860_s17   ;;  %s580_s16 = sphi %s620_s16, %s859_s16   ;;  %s576_s15 = sphi %s618_s15, %s858_s15  }
   0x8   : > { %s643_s21 = sadd.s32 1, %s588_s18   ;;  %s30_s22 = sadd.s32 1, %s584_s17 }
   0x9   : > { %s27_s23 = ssub.s32 %s588_s18, %s643_s21  ;;  %p37_p0 = scmp.ne.s32.totalorder %s584_s17, %s580_s16 }
   0xa   : > { %p28_p1 = scmp.eq.s32.totalorder %s27_s23, 0  ;;  %p38_p2 = scmp.eq.s32.totalorder %s588_s18, 0 }
   0xb   : > { %p43_p3 = scmp.ne.s32.totalorder %s580_s16, %s576_s15  ;;  %p44_p4 = scmp.eq.s32.totalorder %s639_s19, 0 }
   0xc   : > { %s655_s24 = scalar_select %p28_p1, %s584_s17, %s30_s22  }
   0xd   : > { %p657_p5 = por %p38_p2, %p37_p0  ;;  %p661_p6 = por %p44_p4, %p43_p3 }
   0xe   : > { %p135_p7 = scmp.eq.s32.totalorder %s639_s19, 1  ;;  %p141_p8 = scmp.eq.s32.totalorder %s388_s20, 1 }
   0xf   : > { %s846_s26 = scalar_select %p661_p6, 1, 0 }
  0x10   : > { %p422_p10 = scmp.lt.s32.totalorder %s588_s18, 2  ;;  %p668_p11 = por %p135_p7, %p37_p0 }
  0x11   : > { %p672_p12 = por %p141_p8, %p43_p3  ;;  %s677_s29 = sand.u32 1, %s584_s17  }
  0x12   : > { %s847_s27 = scalar_select %p668_p11, 1, 0 }
  0x13   : > { %s848_s28 = scalar_select %p672_p12, 1, 0 }
  0x14   : > { %s392_s30 = sshll.u32 %s588_s18, 7  ;;  %s391_s5 = sshll.u32 %s677_s29, 3 }
  0x15   : > { %s686_s8 = scalar_lea.hbm %s838_s0, %s392_s30  ;;  %s171_s9 = scalar_lea.vmem [#allocation2], %s391_s5 }
  0x16   : > { %s178_s10 = sshll.u32 %s171_s9, 4  ;;  %p692_p13 = pnand %p422_p10, %p657_p5  ;;  %s696_s10 = int_to_ptr.vmem [resolvable:$true] %s178_s10 }
  0x17   : > { %s168_s12 = scalar_lea.sflag [#allocation3], %s677_s29  ;;  %s458_s13 = scalar_lea.hbm %s686_s8, 128 }
  0x18   : > { %p459_p2 = scmp.ne.s32.totalorder %s686_s8, %s458_s13  ;;  %p460_p3 = pneg %p692_p13 }
  0x19   : > { %s463_s22 = scalar_lea.hbm %s838_s0, 256  ;;  %p464_p5 = scmp.lt.u32.totalorder %s686_s8, %s838_s0 }
  0x1a   : > { %p461_p4 = pnand %p460_p3, %p459_p2  ;;  %p465_p8 = scmp.lt.u32.totalorder %s463_s22, %s458_s13 }
  0x1b   : > { %p467_p9 = scmp.lt.u32.totalorder %s458_s13, %s686_s8 }
  0x1c   : > { %p462_p7 = pneg %p461_p4  ;;  %p466_p10 = por %p465_p8, %p464_p5 }
  0x1e   : > { %p468_p0 = por %p467_p9, %p466_p10 }
  0x20   : > { %p469_p1 = pnand %p468_p0, %p462_p7 }
  0x22   : > { %472 = shalt.err (!%p469_p1)
}
  0x23   : > { %s473_s6 = scalar_lea.vmem %s696_s10, 128  ;;  %s590_s7 = smov [#allocation2]  }
  0x24   : > { %p474_p2 = scmp.ne.s32.totalorder %s696_s10, %s473_s6  ;;  %s478_s9 = sshll.u32 %s590_s7, 4  ;;  %s479_s9 = int_to_ptr.vmem [resolvable:$false] %s478_s9 }
  0x25   : > { %s480_s14 = scalar_lea.vmem %s479_s9, 256  ;;  %p481_p11 = scmp.lt.s32.totalorder %s696_s10, %s479_s9 }
  0x26   : > { %p476_p4 = pnand %p474_p2, %p460_p3  ;;  %p482_p5 = scmp.lt.s32.totalorder %s480_s14, %s473_s6 }
  0x28   : > { %p477_p12 = pneg %p476_p4  ;;  %p483_p8 = por %p482_p5, %p481_p11 }
  0x2a   : > { %p484_p9 = pnand %p483_p8, %p477_p12 }
  0x2c   : > { %487 = shalt.err (!%p484_p9)
}
  0x2d   : > { %414 = dma.hbm_to_vmem [thread:$0]  (!%p692_p13), %s686_s8, 128, %s696_s10, %s168_s12  }
  0x2e   : > { %p850_p0 = scmp.lt.s32.totalorder %s588_s18, 3  ;;  %p851_p1 = scmp.ge.s32.totalorder %s588_s18, 1 }
  0x2f   : > { %s739_s23 = scalar_lea.hbm %s839_s1, %s392_s30  ;;  %s189_s25 = scalar_lea.vmem [#allocation5], %s391_s5 }
  0x30   : > { %p730_p7 = pnand %p851_p1, %p850_p0  ;;  %s196_s6 = sshll.u32 %s189_s25, 4  ;;  %s197_s6 = int_to_ptr.vmem [resolvable:$true] %s196_s6 }
  0x31   : > { %s186_s8 = scalar_lea.sflag [#allocation6], %s677_s29  ;;  %s488_s10 = scalar_lea.hbm %s739_s23, 128 }
  0x32   : > { %s852_s13 = scalar_select %p730_p7, 1, 0 }
  0x33   : > { %p489_p11 = scmp.ne.s32.totalorder %s739_s23, %s488_s10  ;;  %s493_s30 = scalar_lea.hbm %s839_s1, 256 }
  0x34   : > { %p494_p2 = scmp.lt.u32.totalorder %s739_s23, %s839_s1  ;;  %p495_p4 = scmp.lt.u32.totalorder %s493_s30, %s488_s10 }
  0x35   : > { %p491_p12 = pnand %p489_p11, %p460_p3  ;;  %p497_p8 = scmp.lt.u32.totalorder %s488_s10, %s739_s23 }
  0x36   : > { %p496_p5 = por %p495_p4, %p494_p2 }
  0x37   : > { %p492_p10 = pneg %p491_p12 }
  0x38   : > { %p498_p9 = por %p497_p8, %p496_p5 }
  0x3a   : > { %p499_p0 = pnand %p498_p9, %p492_p10 }
  0x3c   : > { %502 = shalt.err (!%p499_p0)
}
  0x3d   : > { %s503_s29 = scalar_lea.vmem %s197_s6, 128  ;;  %s591_s5 = smov [#allocation5]  }
  0x3e   : > { %p504_p1 = scmp.ne.s32.totalorder %s197_s6, %s503_s29  ;;  %s508_s20 = sshll.u32 %s591_s5, 4  ;;  %s509_s20 = int_to_ptr.vmem [resolvable:$false] %s508_s20 }
  0x3f   : > { %s510_s22 = scalar_lea.vmem %s509_s20, 256  ;;  %p511_p6 = scmp.lt.s32.totalorder %s197_s6, %s509_s20 }
  0x40   : > { %p506_p11 = pnand %p504_p1, %p460_p3  ;;  %p512_p7 = scmp.lt.s32.totalorder %s510_s22, %s503_s29 }
  0x42   : > { %p507_p12 = pneg %p506_p11  ;;  %p513_p2 = por %p512_p7, %p511_p6 }
  0x44   : > { %p514_p4 = pnand %p513_p2, %p507_p12 }
  0x46   : > { %517 = shalt.err (!%p514_p4)
}
  0x47   : > { %417 = dma.hbm_to_vmem [thread:$0]  (!%p692_p13), %s739_s23, 128, %s197_s6, %s186_s8  }
  0x48   : > { %p853_p10 = scmp.ne.s32.totalorder %s852_s13, 0 }
  0x49   : > { %s766_s25 = sand.u32 (!%p853_p10), 1, %s580_s16   ;;  %p854_p6 = scmp.ne.s32.totalorder (!%p853_p10), %s846_s26, 0 }
  0x4a   : > { %205 = sbr.rel (%p853_p10) target bundleno = 412 (0x19c), region = 36  ;;  %s769_s10 = sshll.u32 (!%p853_p10), %s766_s25, 3 }
  0x4b   : > { %s208_s12 = scalar_lea.sflag (!%p853_p10), [#allocation3], %s766_s25  ;;  %s211_s7 = scalar_lea.vmem (!%p853_p10), [#allocation2], %s769_s10 }
  0x51   : > { %563 = dma.done.wait (%p854_p6), %s208_s12, 128  }
  0x52   : > { %565 = vsyncadd (%p854_p6), %s208_s12, 4294967168  ;;  %s217_s11 = scalar_lea.sflag [#allocation6], %s766_s25  ;;  %s220_s13 = scalar_lea.vmem [#allocation5], %s769_s10 }
  0x53   : > { %567 = dma.done.wait (%p854_p6), %s217_s11, 128  }
  0x54   : > { %569 = vsyncadd (%p854_p6), %s217_s11, 4294967168  ;;  %v250_v0 = vld [vmem:[%s211_s7] sm:$0xff]  ;;  %v251_v1 = vld [vmem:[%s220_s13] sm:$0xff]  ;;  %s402_s30 = sshll.u32 %s639_s19, 7  ;;  %s249_s9 = scalar_lea.vmem [#allocation7], %s769_s10 }
  0x55   : > { %v252_v2 = vadd.f32 %v251_v1, %v250_v0  ;;  %v399_v11 = vld [vmem:[%s840_s2] ss:$0 sm:$0xff]  ;;  %s295_s14 = sshll.u32 %s249_s9, 4  ;;  %s794_s20 = scalar_lea.hbm %s842_s4, %s402_s30  ;;  %s796_s14 = int_to_ptr.vmem [resolvable:$true] %s295_s14 }
  0x56   : > { %v400_v13 = vld [vmem:[%s841_s3] ss:$0 sm:$0xff]  ;;  %s282_s22 = scalar_lea.sflag [#allocation4], %s766_s25  ;;  %s518_s12 = scalar_lea.vmem %s796_s14, 128 }
  0x57   : > { %253 = vadd.xlane.f32.xlu0 %v252_v2  ;;  %p519_p13 = scmp.ne.s32.totalorder %s796_s14, %s518_s12  ;;  %p855_p3 = scmp.ne.s32.totalorder %s847_s27, 0 }
  0x58   : > { %s592_s19 = smov [#allocation7]  }
  0x59   : > { %p520_p7 = pnand %p519_p13, %p855_p3  ;;  %s522_s10 = sshll.u32 %s592_s19, 4  ;;  %s523_s10 = int_to_ptr.vmem [resolvable:$false] %s522_s10 }
  0x5a   : > { %s524_s7 = scalar_lea.vmem %s523_s10, 256  ;;  %p525_p8 = scmp.lt.s32.totalorder %s796_s14, %s523_s10 }
  0x5b   : > { %p521_p5 = pneg %p520_p7  ;;  %p526_p9 = scmp.lt.s32.totalorder %s524_s7, %s518_s12 }
  0x5d   : > { %p527_p0 = por %p526_p9, %p525_p8 }
  0x5f   : > { %p528_p1 = pnand %p527_p0, %p521_p5 }
  0xe4   : > { %v254_v3 = vpop.xlane.xlu0 %253 }
  0xe5   : > { %v255_v4 = vmul.f32 0.0078125, %v254_v3 }
  0xe7   : > { %v256_v5 = vsub.f32 %v252_v2, %v255_v4 }
  0xe9   : > { %v257_v6 = vmul.f32 %v256_v5, %v256_v5 }
  0xeb   : > { %258 = vadd.xlane.f32.xlu0 %v257_v6 }
 0x178   : > { %v259_v7 = vpop.xlane.xlu0 %258 }
 0x179   : > { %v260_v8 = vmul.f32 0.0078125, %v259_v7 }
 0x17b   : > { %v261_v9 = vadd.f32 1e-05, %v260_v8 }
 0x17d   : > { %456 = vrsqrt.f32 %v261_v9 }
 0x187   : > { %v457_v10 = vpop.eup %456 }
 0x188   : > { %v265_v12 = vmul.f32 %v457_v10, %v256_v5 }
 0x18a   : > { %v272_v14 = vmul.f32 %v399_v11, %v265_v12 }
 0x18c   : > { %v279_v15 = vadd.f32 %v400_v13, %v272_v14 }
 0x18e   : > { %280 = vst [vmem:[%s249_s9] sm:$0xff] %v279_v15 }
 0x18f   : > { %531 = shalt.err (!%p528_p1)
}
 0x190   : > { %s532_s25 = scalar_lea.hbm %s794_s20, 128  ;;  %s536_s26 = scalar_lea.hbm %s842_s4, 256 }
 0x191   : > { %p533_p11 = scmp.ne.s32.totalorder %s794_s20, %s532_s25  ;;  %p537_p4 = scmp.lt.u32.totalorder %s794_s20, %s842_s4 }
 0x192   : > { %p538_p10 = scmp.lt.u32.totalorder %s536_s26, %s532_s25  ;;  %p540_p13 = scmp.lt.u32.totalorder %s532_s25, %s794_s20 }
 0x193   : > { %p534_p12 = pnand %p533_p11, %p855_p3 }
 0x194   : > { %p539_p6 = por %p538_p10, %p537_p4 }
 0x195   : > { %p535_p2 = pneg %p534_p12 }
 0x196   : > { %p541_p7 = por %p540_p13, %p539_p6 }
 0x198   : > { %p542_p5 = pnand %p541_p7, %p535_p2 }
 0x19a   : > { %545 = shalt.err (!%p542_p5)
}
 0x19b   : > { %409 = dma.vmem_to_hbm [thread:$0]  (%p855_p3), %s796_s14, 128, %s794_s20, %s282_s22  }
 0x19c PF: > { %s307_s8 = sand.u32 1, %s576_s15   ;;  %p856_p8 = scmp.ne.s32.totalorder %s848_s28, 0 }
 0x19d   : > { %p857_p9 = scmp.ge.s32.totalorder %s588_s18, 2  ;;  %s308_s30 = scalar_lea.sflag [#allocation4], %s307_s8 }
 0x19f   : > { %p419_p0 = pnand %p857_p9, %p856_p8 }
 0x1a1   : > { %571 = dma.done.wait (!%p419_p0), %s308_s30, 128  }
 0x1a2   : > { %573 = vsyncadd (!%p419_p0), %s308_s30, 4294967168  ;;  %p20_p1 = scmp.ge.s32.totalorder %s643_s21, 4   ;;  %s858_s15 = smov %s580_s16 }
 0x1a3   : > { %s859_s16 = smov %s584_s17  ;;  %s860_s17 = smov %s655_s24 }
 0x1a4   : > { %s861_s18 = smov %s643_s21  ;;  %22 = sbr.rel (!%p20_p1) target bundleno = 7 (0x7), region = 94 }
 0x1ab   :  { %313 = vsyncpa [#allocation3], 1 }
 0x1ac   :  { %315 = vsyncpa [#allocation3 + $0x1], 1 }
 0x1ad   :  { %316 = vsyncpa [#allocation6], 1 }
 0x1ae   :  { %318 = vsyncpa [#allocation6 + $0x1], 1 }
 0x1af   :  { %319 = vsyncpa [#allocation4], 1 }
 0x1b0   :  { %321 = vsyncpa [#allocation4 + $0x1], 1 }

</bundles_post_ra>
